<compile_context>
chip_gen: v7x
topology: tpu7x:2x2x1
jax: 0.10.0
libtpu: 0.0.40
codegen_flags: <defaults>
</compile_context>

<pallas_src>
import functools
import math

import jax
import jax.numpy as jnp
from jax.experimental import pallas as pl
from jax.experimental.pallas import tpu as pltpu

_INV_SQRT2 = 0.7071067811865476


# ----------------------------------------------------------------------------
# Fused kernel: for each folded batch row  y = W2 @ gelu(W1 @ x + b1) + b2
# operating on lane-dense (C, TM) tiles (C on sublanes, spatial on lanes).
# ----------------------------------------------------------------------------
def _kan_block_kernel(x_ref, w1_ref, b1_ref, w2_ref, b2_ref, o_ref,
                      *, approximate_gelu=False):
    # x_ref/o_ref: (bb, C, TM)   w*_ref: (C, C)   b*_ref: (C, 1)
    w1 = w1_ref[...]
    b1 = b1_ref[...]
    w2 = w2_ref[...]
    b2 = b2_ref[...]
    bb = x_ref.shape[0]
    for b in range(bb):                       # static unroll; bb is small (<=8)
        x = x_ref[b]                          # (C, TM) lane-dense slice
        h = jnp.dot(w1, x, preferred_element_type=jnp.float32) + b1
        if approximate_gelu:
            # tanh approximation -> EUP slot (v7x option; changes numerics).
            h = jax.nn.gelu(h, approximate=True)
        else:
            # exact GELU (PyTorch nn.GELU default): 0.5*h*(1 + erf(h/sqrt(2)))
            h = 0.5 * h * (1.0 + jax.lax.erf(h * _INV_SQRT2))
        y = jnp.dot(w2, h, preferred_element_type=jnp.float32) + b2
        o_ref[b] = y.astype(o_ref.dtype)


def _largest_divisor_leq(n, cap):
    cap = max(1, min(n, cap))
    for d in range(cap, 0, -1):
        if n % d == 0:
            return d
    return 1


def kan_block_forward(x_nchw, params, tile_bytes=2 * 1024 * 1024,
                      approximate_gelu=False):
    """KANBlock forward. x_nchw: (B, C, H, W) -> (B, C, H, W), f32."""
    B, C, H, W = x_nchw.shape
    M = H * W
    itemsize = 4
    x = x_nchw.reshape(B, C, M)                     # pure reshape, no transpose
    if x.dtype != jnp.float32:
        x = x.astype(jnp.float32)

    # ---- byte-budgeted tiling -------------------------------------------------
    row_bytes = C * M * itemsize
    tm_budget = max(128, (tile_bytes // (C * itemsize)) // 128 * 128)

    if M > tm_budget:
        # Large spatial map: tile M; one batch row per grid step.
        bb = 1
        tm_eff = tm_budget                           # multiple of 128
        m_steps = pl.cdiv(M, tm_eff)                 # ragged last block: OOB writes masked
    else:
        # Whole spatial map fits the budget: fold batch rows into one block.
        tm_eff = M                                   # equals full dim -> always legal
        m_steps = 1
        bb_cap = max(1, tile_bytes // max(1, row_bytes))
        if B >= 2:
            bb_cap = min(bb_cap, B // 2)             # keep >=2 grid steps (v7x: 2 TCs)
        bb_cap = min(bb_cap, 8)                      # bound the in-kernel unroll
        bb = _largest_divisor_leq(B, bb_cap)

    # v7x: if the grid collapsed to a single step but M is splittable, split it.
    if (B // bb) * m_steps == 1 and M >= 256:
        tm_eff = pl.cdiv(pl.cdiv(M, 2), 128) * 128
        m_steps = pl.cdiv(M, tm_eff)

    grid = (B // bb, m_steps)

    # ---- VMEM budget: 2x in + 2x out double-buffers + ~2 temporaries + slack --
    block_bytes = bb * C * tm_eff * itemsize
    vmem_limit = int(min(48 * 1024 * 1024,
                         max(32 * 1024 * 1024, 8 * block_bytes + (2 << 20))))

    w1 = params["fc1_w"].reshape(C, C).astype(jnp.float32)   # (Cout, Cin)
    w2 = params["fc2_w"].reshape(C, C).astype(jnp.float32)
    b1 = params["fc1_b"].reshape(C, 1).astype(jnp.float32)
    b2 = params["fc2_b"].reshape(C, 1).astype(jnp.float32)

    kernel = functools.partial(_kan_block_kernel, approximate_gelu=approximate_gelu)

    out = pl.pallas_call(
        kernel,
        out_shape=jax.ShapeDtypeStruct((B, C, M), jnp.float32),
        grid=grid,
        in_specs=[
            pl.BlockSpec((bb, C, tm_eff), lambda b, m: (b, 0, m)),
            pl.BlockSpec((C, C), lambda b, m: (0, 0)),
            pl.BlockSpec((C, 1), lambda b, m: (0, 0)),
            pl.BlockSpec((C, C), lambda b, m: (0, 0)),
            pl.BlockSpec((C, 1), lambda b, m: (0, 0)),
        ],
        out_specs=pl.BlockSpec((bb, C, tm_eff), lambda b, m: (b, 0, m)),
        compiler_params=pltpu.CompilerParams(
            dimension_semantics=("parallel", "parallel"),
            vmem_limit_bytes=vmem_limit),
    )(x, w1, b1, w2, b2)

    return out.reshape(B, C, H, W)


# ----------------------------------------------------------------------------
# Parameter init (PyTorch Conv2d default: U(-1/sqrt(fan_in), 1/sqrt(fan_in)))
# ----------------------------------------------------------------------------
def init_kan_block_params(key, dim):
    k1, k2, k3, k4 = jax.random.split(key, 4)
    bound = 1.0 / math.sqrt(dim)  # fan_in = dim * 1 * 1
    p = {
        "fc1_w": jax.random.uniform(k1, (dim, dim, 1, 1), minval=-bound, maxval=bound),
        "fc1_b": jax.random.uniform(k2, (dim,), minval=-bound, maxval=bound),
        "fc2_w": jax.random.uniform(k3, (dim, dim, 1, 1), minval=-bound, maxval=bound),
        "fc2_b": jax.random.uniform(k4, (dim,), minval=-bound, maxval=bound),
    }
    return {k: v.astype(jnp.float32) for k, v in p.items()}


# Pure-JAX reference (same math, no Pallas) for correctness checks.
def kan_block_reference(x, params):
    C = x.shape[1]
    w1 = params["fc1_w"].reshape(C, C)
    w2 = params["fc2_w"].reshape(C, C)
    h = jnp.einsum("oc,bchw->bohw", w1, x) + params["fc1_b"][None, :, None, None]
    h = 0.5 * h * (1.0 + jax.lax.erf(h * _INV_SQRT2))
    y = jnp.einsum("oc,bchw->bohw", w2, h) + params["fc2_b"][None, :, None, None]
    return y


# ----------------------------------------------------------------------------
if __name__ == "__main__":
    key = jax.random.PRNGKey(0)
    kx, kp = jax.random.split(key)

    # Main check: B=2, C=4, 16x16 map.
    B, C, H, W = 2, 4, 16, 16
    x = jax.random.normal(kx, (B, C, H, W), dtype=jnp.float32)
    params = init_kan_block_params(kp, C)

    fwd = jax.jit(functools.partial(kan_block_forward))
    y = fwd(x, params)
    jax.block_until_ready(y)
    assert y.shape == (B, C, H, W), y.shape
    max_err = float(jnp.max(jnp.abs(y - kan_block_reference(x, params))))
    assert max_err < 1e-4, f"mismatch vs reference: {max_err}"

    # Extra check 1: batch-folded path (bb > 1) on a small feature map.
    x2 = jax.random.normal(jax.random.PRNGKey(1), (4, 4, 16, 8), dtype=jnp.float32)
    y2 = jax.jit(kan_block_forward)(x2, params)
    jax.block_until_ready(y2)
    err2 = float(jnp.max(jnp.abs(y2 - kan_block_reference(x2, params))))
    assert err2 < 1e-4, f"bb-folded path mismatch: {err2}"

    # Extra check 2: spatial-tiled path with a ragged last block (no wrapper
    # pad/slice) by forcing a tiny tile budget.
    x3 = jax.random.normal(jax.random.PRNGKey(2), (2, 4, 20, 20), dtype=jnp.float32)
    y3 = jax.jit(functools.partial(kan_block_forward, tile_bytes=2048))(x3, params)
    jax.block_until_ready(y3)
    err3 = float(jnp.max(jnp.abs(y3 - kan_block_reference(x3, params))))
    assert err3 < 1e-4, f"ragged-tile path mismatch: {err3}"

    print("KERNEL_OK")
</pallas_src>

<mosaic_0001>
module attributes {stable_mosaic.version = 11 : i64} {
  func.func @_kan_block_kernel(%arg0: i32, %arg1: i32, %arg2: memref<1x4x256xf32, #tpu.memory_space<vmem>>, %arg3: memref<4x4xf32, #tpu.memory_space<vmem>>, %arg4: memref<4x1xf32, #tpu.memory_space<vmem>>, %arg5: memref<4x4xf32, #tpu.memory_space<vmem>>, %arg6: memref<4x1xf32, #tpu.memory_space<vmem>>, %arg7: memref<1x4x256xf32, #tpu.memory_space<vmem>>) attributes {dimension_semantics = [#tpu.dimension_semantics<parallel>, #tpu.dimension_semantics<parallel>], iteration_bounds = array<i64: 2, 1>, scalar_prefetch = 0 : i64, scratch_operands = 0 : i64, tpu.core_type = #tpu.core_type<tc>, window_params = [{transform_indices = @transform_0, window_bounds = array<i64: 1, 4, 256>}, {pipeline_mode = #tpu.pipeline_mode<synchronous>, transform_indices = @transform_1, window_bounds = array<i64: 4, 4>}, {pipeline_mode = #tpu.pipeline_mode<synchronous>, transform_indices = @transform_2, window_bounds = array<i64: 4, 1>}, {pipeline_mode = #tpu.pipeline_mode<synchronous>, transform_indices = @transform_3, window_bounds = array<i64: 4, 4>}, {pipeline_mode = #tpu.pipeline_mode<synchronous>, transform_indices = @transform_4, window_bounds = array<i64: 4, 1>}, {transform_indices = @transform_5, window_bounds = array<i64: 1, 4, 256>}]} {
    %c0 = arith.constant 0 : index
    %c0_0 = arith.constant 0 : index
    %0 = vector.load %arg3[%c0, %c0_0] : memref<4x4xf32, #tpu.memory_space<vmem>>, vector<4x4xf32>
    %c0_1 = arith.constant 0 : index
    %c0_2 = arith.constant 0 : index
    %1 = vector.load %arg4[%c0_1, %c0_2] : memref<4x1xf32, #tpu.memory_space<vmem>>, vector<4x1xf32>
    %c0_3 = arith.constant 0 : index
    %c0_4 = arith.constant 0 : index
    %2 = vector.load %arg5[%c0_3, %c0_4] : memref<4x4xf32, #tpu.memory_space<vmem>>, vector<4x4xf32>
    %c0_5 = arith.constant 0 : index
    %c0_6 = arith.constant 0 : index
    %3 = vector.load %arg6[%c0_5, %c0_6] : memref<4x1xf32, #tpu.memory_space<vmem>>, vector<4x1xf32>
    %c0_7 = arith.constant 0 : index
    %c0_8 = arith.constant 0 : index
    %c0_9 = arith.constant 0 : index
    %4 = vector.load %arg2[%c0_7, %c0_8, %c0_9] : memref<1x4x256xf32, #tpu.memory_space<vmem>>, vector<1x4x256xf32>
    %5 = vector.shape_cast %4 : vector<1x4x256xf32> to vector<4x256xf32>
    %cst = arith.constant dense<0.000000e+00> : vector<4x256xf32>
    %6 = tpu.matmul %0, %5, %cst {dimension_numbers = #tpu.dot_dimension_numbers<[1], [0], [0], [1], [0, 0, 1, 1], [], []>} : vector<4x4xf32>, vector<4x256xf32>, vector<4x256xf32> -> vector<4x256xf32>
    %7 = vector.broadcast %1 : vector<4x1xf32> to vector<4x256xf32>
    %8 = arith.addf %6, %7 : vector<4x256xf32>
    %cst_10 = arith.constant 5.000000e-01 : f32
    %9 = vector.broadcast %cst_10 : f32 to vector<4x256xf32>
    %10 = arith.mulf %9, %8 : vector<4x256xf32>
    %cst_11 = arith.constant 0.707106769 : f32
    %11 = vector.broadcast %cst_11 : f32 to vector<4x256xf32>
    %12 = arith.mulf %8, %11 : vector<4x256xf32>
    %13 = math.erf %12 : vector<4x256xf32>
    %cst_12 = arith.constant 1.000000e+00 : f32
    %14 = vector.broadcast %cst_12 : f32 to vector<4x256xf32>
    %15 = arith.addf %14, %13 : vector<4x256xf32>
    %16 = arith.mulf %10, %15 : vector<4x256xf32>
    %cst_13 = arith.constant dense<0.000000e+00> : vector<4x256xf32>
    %17 = tpu.matmul %2, %16, %cst_13 {dimension_numbers = #tpu.dot_dimension_numbers<[1], [0], [0], [1], [0, 0, 1, 1], [], []>} : vector<4x4xf32>, vector<4x256xf32>, vector<4x256xf32> -> vector<4x256xf32>
    %18 = vector.broadcast %3 : vector<4x1xf32> to vector<4x256xf32>
    %19 = arith.addf %17, %18 : vector<4x256xf32>
    %c0_14 = arith.constant 0 : index
    %c0_15 = arith.constant 0 : index
    %c0_16 = arith.constant 0 : index
    %20 = vector.load %arg7[%c0_14, %c0_15, %c0_16] : memref<1x4x256xf32, #tpu.memory_space<vmem>>, vector<1x4x256xf32>
    %21 = vector.shape_cast %20 : vector<1x4x256xf32> to vector<4x256xf32>
    %22 = vector.shape_cast %19 : vector<4x256xf32> to vector<1x4x256xf32>
    tpu.vector_store %arg7[%c0_14, %c0_15, %c0_16], %22 {strides = array<i32>} : memref<1x4x256xf32, #tpu.memory_space<vmem>>, vector<1x4x256xf32>,
    return
  }
  func.func @transform_0(%arg0: i32, %arg1: i32) -> (i32, i32, i32) {
    %c0_i32 = arith.constant 0 : i32
    %c0_i32_0 = arith.constant 0 : i32
    return %arg0, %c0_i32, %arg1 : i32, i32, i32
  }
  func.func @transform_1(%arg0: i32, %arg1: i32) -> (i32, i32) {
    %c0_i32 = arith.constant 0 : i32
    %c0_i32_0 = arith.constant 0 : i32
    %c0_i32_1 = arith.constant 0 : i32
    return %c0_i32, %c0_i32_0 : i32, i32
  }
  func.func @transform_2(%arg0: i32, %arg1: i32) -> (i32, i32) {
    %c0_i32 = arith.constant 0 : i32
    %c0_i32_0 = arith.constant 0 : i32
    %c0_i32_1 = arith.constant 0 : i32
    return %c0_i32, %c0_i32_0 : i32, i32
  }
  func.func @transform_3(%arg0: i32, %arg1: i32) -> (i32, i32) {
    %c0_i32 = arith.constant 0 : i32
    %c0_i32_0 = arith.constant 0 : i32
    %c0_i32_1 = arith.constant 0 : i32
    return %c0_i32, %c0_i32_0 : i32, i32
  }
  func.func @transform_4(%arg0: i32, %arg1: i32) -> (i32, i32) {
    %c0_i32 = arith.constant 0 : i32
    %c0_i32_0 = arith.constant 0 : i32
    %c0_i32_1 = arith.constant 0 : i32
    return %c0_i32, %c0_i32_0 : i32, i32
  }
  func.func @transform_5(%arg0: i32, %arg1: i32) -> (i32, i32, i32) {
    %c0_i32 = arith.constant 0 : i32
    %c0_i32_0 = arith.constant 0 : i32
    return %arg0, %c0_i32, %arg1 : i32, i32, i32
  }
}

</mosaic_0001>

<bundles_post_ra>
// kernel: kan_block_forward.1
= control target key start
LH: loop header
LB: loop body
LE: loop exit
PB: predicated region body
PF: predicated region fallthrough
CT: control target
= control target key end

     0   :  { %s650_s18 = smov 0   ;;  %s652_s19 = smov 0   ;;  %s708_s0 = inlined_call_operand.vmem [shape: f32[2,4,256], index: 0, kind: input, shape index: {}]   ;;  %s709_s1 = inlined_call_operand.vmem [shape: f32[4,4], index: 1, kind: input, shape index: {}]   ;;  %s710_s2 = inlined_call_operand.vmem [shape: f32[4,1], index: 2, kind: input, shape index: {}]   ;;  %s711_s3 = inlined_call_operand.vmem [shape: f32[4,4], index: 3, kind: input, shape index: {}]   ;;  %s712_s4 = inlined_call_operand.vmem [shape: f32[4,1], index: 4, kind: input, shape index: {}]   ;;  %s713_s5 = inlined_call_operand.vmem [shape: f32[2,4,256], index: 5, kind: output, shape index: {}]  }
   0x1   :  { %s654_s20 = smov 0  }
   0x2 LB: > { %s27_s21 = sadd.s32 1, %s612_s19  ;;  %p547_p0 = scmp.ge.s32.totalorder %s616_s20, 1  ;;  %s616_s20 = sphi %s654_s20, %s15_s20   ;;  %s612_s19 = sphi %s652_s19, %s715_s19   ;;  %s608_s18 = sphi %s650_s18, %s714_s18  }
   0x3   : > { %p29_p1 = scmp.ge.s32.totalorder %s27_s21, 2  ;;  %p208_p2 = scmp.lt.s32.totalorder %s616_s20, 3 }
   0x5   : > { %s717_s21 = smov (%p29_p1, %s27_s21), 0  ;;  %p209_p3 = pnand %p547_p0, %p208_p2 }
   0x6   : > { %p245_p4 = scmp.lt.s32.totalorder (!%p209_p3), %s608_s18, 1  ;;  %v618_v0 = vmov (!%p209_p3), 0.0   ;;  %v265_v1 = vld [vmem:[%s710_s2] sm:$0xf] (!%p209_p3)  ;;  %v619_v2 = vmov (!%p209_p3), 0   ;;  %vm280_vm0 = vcmask (!%p209_p3), 1043456  }
   0x7   : > { %212 = sbr.rel (%p209_p3) target bundleno = 474 (0x1da), region = 40  ;;  %349 = vmatprep.mubr.f32.mxu0 (!%p209_p3), %v618_v0  ;;  %444 = vmatprep.mubr.f32.mxu1 (!%p209_p3), %v618_v0  ;;  %v267_v3 = vld [vmem:[%s712_s4] sm:$0xf] (!%p209_p3)  ;;  %vm276_vm1 = vcmask (!%p209_p3), 31744  }
   0x8   : > { %588 = vset.pattern.permute.xlu0 (!%p209_p3), %v619_v2  ;;  %v264_v6 = vld [vmem:[%s709_s1] sm:$0xf] (!%p209_p3) }
   0x9   : > { %271 = vperm.xlu0 (!%p209_p3), %588, %v265_v1   ;;  %v266_v22 = vld [vmem:[%s711_s3] sm:$0xf] (!%p209_p3) }
   0xd   : > { %368 = vperm.xlu0 (!%p209_p3), %588, %v267_v3  }
   0xe   : > { %s719_s18 = smov (!%p245_p4, %s608_s18), 1 }
   0xf   : > { %s560_s24 = sshll.u32 %s719_s18, 3 }
  0x10   : > { %s252_s29 = scalar_lea.vmem %s708_s0, %s560_s24  ;;  %s262_s11 = scalar_lea.vmem %s713_s5, %s560_s24 }
  0x11   : > { %v268_v4 = vld [vmem:[%s252_s29] sm:$0xff] }
  0x12   : > { %v275_v5 = vcombine.high %v268_v4, %v268_v4 }
  0x14   : > { %552 = vmatprep.subr.msk.mxu0 %vm280_vm0, %v275_v5 }
  0x15   : > { %553 = vmatpush1.msk.msra.mxu0 %vm280_vm0, %v268_v4 }
  0x16   : > { %554 = vmatmul.mubr.msk.f32.vlgmr.msra.gmra.mrb[0].mxu0 %vm276_vm1, %v264_v6 }
  0x88   : > { %v272_v7 = vpop.permute.xlu0 %271 }
  0x8c   : > { %v369_v23 = vpop.permute.xlu0 %368 }
  0xe9   : > { %v351_v8 = vpop.f32.mrb[0].mxu0 }
  0xea   : > { %v352_v9 = vadd.f32 %v351_v8, %v272_v7  ;;  %v353_v10 = vpop.f32.mrb[1].mxu0 }
  0xeb   : > { %v354_v11 = vadd.f32 %v353_v10, %v272_v7 }
  0xec   : > { %v358_v12 = vmul.f32 0.70710677, %v352_v9  ;;  %v356_v19 = vmul.f32 0.5, %v352_v9 }
  0xed   : > { %v359_v13 = vmul.f32 0.70710677, %v354_v11  ;;  %v357_v17 = vmul.f32 0.5, %v354_v11 }
  0xee   : > { %590 = verf.f32 %v358_v12 }
  0xef   : > { %592 = verf.f32 %v359_v13 }
  0xf8   : > { %v591_v14 = vpop.eup %590 }
  0xf9   : > { %v593_v15 = vpop.eup %592  ;;  %v362_v16 = vadd.f32 1.0, %v591_v14 }
  0xfa   : > { %v363_v18 = vadd.f32 1.0, %v593_v15 }
  0xfb   : > { %v364_v21 = vmul.f32 %v362_v16, %v356_v19 }
  0xfc   : > { %v365_v20 = vmul.f32 %v363_v18, %v357_v17 }
  0xfe   : > { %555 = vmatprep.subr.msk.mxu1 %vm280_vm0, %v365_v20 }
  0xff   : > { %556 = vmatpush1.msk.msra.mxu1 %vm280_vm0, %v364_v21 }
 0x100   : > { %557 = vmatmul.mubr.msk.f32.vlgmr.msra.gmra.mrb[0].mxu1 %vm276_vm1, %v266_v22 }
 0x1d3   : > { %v446_v24 = vpop.f32.mrb[0].mxu1 }
 0x1d4   : > { %v447_v25 = vadd.f32 %v446_v24, %v369_v23  ;;  %v448_v26 = vpop.f32.mrb[1].mxu1 }
 0x1d5   : > { %v449_v27 = vadd.f32 %v448_v26, %v369_v23 }
 0x1d7   : > { %v453_v28 = vcombine.low %v447_v25, %v449_v27 }
 0x1d9   : > { %455 = vst [vmem:[%s262_s11] sm:$0xff] %v453_v28 }
 0x1da PF: > { %s15_s20 = sadd.s32 1, %s616_s20   ;;  %s714_s18 = smov %s612_s19 }
 0x1db   : > { %p12_p5 = scmp.ge.s32.totalorder %s15_s20, 4   ;;  %s715_s19 = smov %s717_s21 }
 0x1dd   :  { %14 = sbr.rel (!%p12_p5) target bundleno = 2 (0x2), region = 70 }

</bundles_post_ra>
